<compile_context>
chip_gen: v5e
topology: v5e:2x2
jax: 0.10.0
libtpu: 0.0.40
codegen_flags: <defaults>
</compile_context>

<pallas_src>
import functools

import jax
import jax.numpy as jnp
from jax.experimental import pallas as pl
from jax.experimental.pallas import tpu as pltpu

_VPU_MAX_CIN = 8  # below this, use unrolled VPU FMAs instead of the MXU dot


# ---------------------------------------------------------------------------
# Kernels
# ---------------------------------------------------------------------------
def _gdc_kernel_mxu(x_ref, w_ref, bias_ref, o_ref):
    # x_ref:    (1, C_in,  T)   activation tile (spatial on the lane axis)
    # w_ref:    (C_out, C_in)   BN-scale-folded 1x1 conv weights
    # bias_ref: (C_out, 1)      fused BN bias (f32)
    # o_ref:    (1, C_out, T)   output tile (lane-dense)
    acc = jnp.dot(w_ref[...], x_ref[0], preferred_element_type=jnp.float32)
    o_ref[0] = (acc + bias_ref[...]).astype(o_ref.dtype)


def _gdc_kernel_vpu(x_ref, w_ref, bias_ref, o_ref):
    # Tiny-channel variant: C_in unrolled FMAs on the VPU.  (C_in=4 would fill
    # only 4/256 of the MXU contraction; the op is HBM-bound anyway.)
    x = x_ref[0].astype(jnp.float32)        # (C_in, T)
    w = w_ref[...].astype(jnp.float32)      # (C_out, C_in), kept f32 by wrapper
    c_in = w.shape[1]
    acc = w[:, 0:1] * x[0:1, :]
    for c in range(1, c_in):                # static unroll (c_in is trace-time)
        acc = acc + w[:, c:c + 1] * x[c:c + 1, :]
    o_ref[0] = (acc + bias_ref[...]).astype(o_ref.dtype)


# ---------------------------------------------------------------------------
# Tiling / VMEM policy (generation-aware)
# ---------------------------------------------------------------------------
def _vmem_budgets():
    """(working-set budget for the double-buffered blocks, vmem_limit_bytes)."""
    try:
        cap = int(pltpu.get_tpu_info().vmem_capacity_bytes)
    except Exception:  # pragma: no cover - conservative fallback (v7x per-TC)
        cap = 64 * 1024 * 1024
    work = (cap * 3) // 8                                  # 24 MiB v7x, 48 MiB v5e/v6e
    limit = min(cap - 8 * 1024 * 1024, work + 16 * 1024 * 1024)
    return work, limit


def _derive_spatial_tile(n, hw, c_in, c_out, dtype_bytes, work_bytes,
                         min_total_steps=8):
    """Largest lane-dense spatial tile that fits the VMEM budget, then shrink
    (not below 512 lanes for big images / 128 otherwise) until there are enough
    grid steps for pipeline overlap and megacore sharding."""
    if hw <= 128:
        return hw  # full-extent block (legal); caller packs batch onto lanes
    per_lane = 2 * (c_in + c_out) * dtype_bytes            # 2 buffers for x and o blocks
    t_cap = max(128, (work_bytes // per_lane) // 128 * 128)
    t_sp = hw if hw <= t_cap else t_cap
    t_floor = 512 if hw >= 512 else 128
    while n * pl.cdiv(hw, t_sp) < min_total_steps:
        new_t = (t_sp // 2) // 128 * 128
        if new_t < t_floor:
            break
        t_sp = new_t
    return t_sp


# ---------------------------------------------------------------------------
# pallas_call wrapper
# ---------------------------------------------------------------------------
def _gdc_matmul(x3d, w2d, bias2d):
    """x3d: (N, C_in, L), w2d: (C_out, C_in), bias2d: (C_out, 1) f32 -> (N, C_out, L)."""
    n, c_in, hw = x3d.shape
    c_out = w2d.shape[0]
    dtype_bytes = jnp.dtype(x3d.dtype).itemsize

    work_bytes, vmem_limit = _vmem_budgets()
    t_sp = _derive_spatial_tile(n, hw, c_in, c_out, dtype_bytes, work_bytes)
    n_sp = pl.cdiv(hw, t_sp)                # tail tile handled by masked stores

    kernel = _gdc_kernel_vpu if c_in <= _VPU_MAX_CIN else _gdc_kernel_mxu

    # NOTE: if a trace still shows exposed DMA at step boundaries, sweep
    # pipeline_mode=pl.Buffered(3) on the x BlockSpec (strided C_in-row gather).
    return pl.pallas_call(
        kernel,
        out_shape=jax.ShapeDtypeStruct((n, c_out, hw), x3d.dtype),
        grid_spec=pltpu.PrefetchScalarGridSpec(
            num_scalar_prefetch=0,
            grid=(n, n_sp),
            in_specs=[
                pl.BlockSpec((1, c_in, t_sp), lambda b, s: (b, 0, s)),
                pl.BlockSpec((c_out, c_in), lambda b, s: (0, 0)),
                pl.BlockSpec((c_out, 1), lambda b, s: (0, 0)),
            ],
            out_specs=pl.BlockSpec((1, c_out, t_sp), lambda b, s: (b, 0, s)),
        ),
        compiler_params=pltpu.CompilerParams(
            dimension_semantics=("parallel", "parallel"),
            vmem_limit_bytes=int(vmem_limit),
        ),
    )(x3d, w2d, bias2d)


@functools.partial(jax.jit, static_argnames=("eps",))
def gdc_forward(x_nchw, conv_w, bn_gamma, bn_beta, bn_mean, bn_var, eps=1e-5):
    """GDC forward: 1x1 conv (no bias) + BatchNorm2d (inference). NCHW in/out.

    x_nchw : (N, C_in, H, W)
    conv_w : (C_out, C_in, 1, 1)   -- PyTorch Conv2d weight layout
    """
    n, c_in, h, w = x_nchw.shape
    c_out = conv_w.shape[0]
    hw = h * w

    # Fold BN (inference) into the weights and a per-channel bias:
    #   y = scale * (W @ x) + bias = (scale * W) @ x + bias
    inv_std = jax.lax.rsqrt(bn_var.astype(jnp.float32) + eps)
    scale = bn_gamma.astype(jnp.float32) * inv_std
    bias = bn_beta.astype(jnp.float32) - bn_mean.astype(jnp.float32) * scale
    w2d = conv_w.reshape(c_out, c_in).astype(jnp.float32) * scale[:, None]
    if c_in > _VPU_MAX_CIN:
        w2d = w2d.astype(x_nchw.dtype)       # MXU path: match activation dtype (bf16-friendly)
    bias2d = bias.reshape(c_out, 1)          # f32 epilogue precision

    x3d = x_nchw.reshape(n, c_in, hw)        # free view, no copy

    if hw < 128:
        # Small spatial head (e.g. 7x7): pack batch onto the lane axis so stores
        # stay lane-dense and one matmul amortizes the per-step overhead.
        x_packed = jnp.transpose(x3d, (1, 0, 2)).reshape(1, c_in, n * hw)
        out = _gdc_matmul(x_packed, w2d, bias2d)          # (1, C_out, N*HW)
        out = out.reshape(c_out, n, hw).transpose(1, 0, 2)
        return out.reshape(n, c_out, h, w)

    out3d = _gdc_matmul(x3d, w2d, bias2d)
    return out3d.reshape(n, c_out, h, w)


# ---------------------------------------------------------------------------
# Pure-JAX reference + self-test
# ---------------------------------------------------------------------------
def _reference(x_nchw, conv_w, bn_gamma, bn_beta, bn_mean, bn_var, eps=1e-5):
    y = jnp.einsum(
        "nchw,oc->nohw",
        x_nchw.astype(jnp.float32),
        conv_w.reshape(conv_w.shape[0], conv_w.shape[1]).astype(jnp.float32),
    )
    inv_std = jax.lax.rsqrt(bn_var + eps)
    scale = (bn_gamma * inv_std)[None, :, None, None]
    bias = (bn_beta - bn_mean * bn_gamma * inv_std)[None, :, None, None]
    return y * scale + bias


if __name__ == "__main__":
    key = jax.random.PRNGKey(0)
    k_x, k_w, k_g, k_b, k_m, k_v, k_x2 = jax.random.split(key, 7)

    # Small shapes consistent with GDC's default args.
    N, C_IN, H, W = 2, 4, 16, 16
    C_OUT = 8

    x = jax.random.normal(k_x, (N, C_IN, H, W), dtype=jnp.float32)
    conv_w = jax.random.normal(k_w, (C_OUT, C_IN, 1, 1), dtype=jnp.float32) * 0.1
    bn_gamma = 1.0 + 0.1 * jax.random.normal(k_g, (C_OUT,), dtype=jnp.float32)
    bn_beta = 0.1 * jax.random.normal(k_b, (C_OUT,), dtype=jnp.float32)
    bn_mean = 0.05 * jax.random.normal(k_m, (C_OUT,), dtype=jnp.float32)
    bn_var = jnp.abs(jax.random.normal(k_v, (C_OUT,), dtype=jnp.float32)) + 0.5

    ref = _reference(x, conv_w, bn_gamma, bn_beta, bn_mean, bn_var)

    # f32 path (auto-derived spatial tiling; grid=(N, spatial_tiles)).
    out = gdc_forward(x, conv_w, bn_gamma, bn_beta, bn_mean, bn_var)
    out = jax.block_until_ready(out)
    assert out.shape == (N, C_OUT, H, W), out.shape
    assert jnp.allclose(out, ref, atol=1e-4, rtol=1e-4), "mismatch vs reference (f32)"

    # bf16 activations through the same dtype-agnostic path (HBM-bound kernel:
    # halving bytes ~ halves runtime on v5e/v6e); epilogue stays f32.
    out_bf16 = gdc_forward(x.astype(jnp.bfloat16), conv_w, bn_gamma, bn_beta,
                           bn_mean, bn_var)
    out_bf16 = jax.block_until_ready(out_bf16)
    assert out_bf16.dtype == jnp.bfloat16
    assert jnp.allclose(out_bf16.astype(jnp.float32), ref, atol=5e-2, rtol=5e-2), \
        "mismatch vs reference (bf16)"

    # Small-H*W head (7x7): batch packed onto the lane axis for lane-dense stores.
    xs = jax.random.normal(k_x2, (N, C_IN, 7, 7), dtype=jnp.float32)
    ref_s = _reference(xs, conv_w, bn_gamma, bn_beta, bn_mean, bn_var)
    out_s = gdc_forward(xs, conv_w, bn_gamma, bn_beta, bn_mean, bn_var)
    out_s = jax.block_until_ready(out_s)
    assert out_s.shape == (N, C_OUT, 7, 7), out_s.shape
    assert jnp.allclose(out_s, ref_s, atol=1e-4, rtol=1e-4), "mismatch vs reference (7x7)"

    print("KERNEL_OK")
</pallas_src>

<mosaic_0001>
module attributes {stable_mosaic.version = 11 : i64} {
  func.func @_gdc_kernel_vpu(%arg0: i32, %arg1: i32, %arg2: memref<1x4x128xf32, #tpu.memory_space<vmem>>, %arg3: memref<8x4xf32, #tpu.memory_space<vmem>>, %arg4: memref<8x1xf32, #tpu.memory_space<vmem>>, %arg5: memref<1x8x128xf32, #tpu.memory_space<vmem>>) attributes {dimension_semantics = [#tpu.dimension_semantics<parallel>, #tpu.dimension_semantics<parallel>], iteration_bounds = array<i64: 2, 2>, scalar_prefetch = 0 : i64, scratch_operands = 0 : i64, tpu.core_type = #tpu.core_type<tc>, window_params = [{transform_indices = @transform_0, window_bounds = array<i64: 1, 4, 128>}, {pipeline_mode = #tpu.pipeline_mode<synchronous>, transform_indices = @transform_1, window_bounds = array<i64: 8, 4>}, {pipeline_mode = #tpu.pipeline_mode<synchronous>, transform_indices = @transform_2, window_bounds = array<i64: 8, 1>}, {transform_indices = @transform_3, window_bounds = array<i64: 1, 8, 128>}]} {
    %c0 = arith.constant 0 : index
    %c0_0 = arith.constant 0 : index
    %c0_1 = arith.constant 0 : index
    %0 = vector.load %arg2[%c0, %c0_0, %c0_1] : memref<1x4x128xf32, #tpu.memory_space<vmem>>, vector<1x4x128xf32>
    %1 = vector.shape_cast %0 : vector<1x4x128xf32> to vector<4x128xf32>
    %c0_2 = arith.constant 0 : index
    %c0_3 = arith.constant 0 : index
    %2 = vector.load %arg3[%c0_2, %c0_3] : memref<8x4xf32, #tpu.memory_space<vmem>>, vector<8x4xf32>
    %3 = vector.extract_strided_slice %2 {offsets = [0, 0], sizes = [8, 1], strides = [1, 1]} : vector<8x4xf32> to vector<8x1xf32>
    %4 = vector.extract_strided_slice %1 {offsets = [0, 0], sizes = [1, 128], strides = [1, 1]} : vector<4x128xf32> to vector<1x128xf32>
    %5 = vector.broadcast %3 : vector<8x1xf32> to vector<8x128xf32>
    %6 = vector.broadcast %4 : vector<1x128xf32> to vector<8x128xf32>
    %7 = arith.mulf %5, %6 : vector<8x128xf32>
    %8 = vector.extract_strided_slice %2 {offsets = [0, 1], sizes = [8, 1], strides = [1, 1]} : vector<8x4xf32> to vector<8x1xf32>
    %9 = vector.extract_strided_slice %1 {offsets = [1, 0], sizes = [1, 128], strides = [1, 1]} : vector<4x128xf32> to vector<1x128xf32>
    %10 = vector.broadcast %8 : vector<8x1xf32> to vector<8x128xf32>
    %11 = vector.broadcast %9 : vector<1x128xf32> to vector<8x128xf32>
    %12 = arith.mulf %10, %11 : vector<8x128xf32>
    %13 = arith.addf %7, %12 : vector<8x128xf32>
    %14 = vector.extract_strided_slice %2 {offsets = [0, 2], sizes = [8, 1], strides = [1, 1]} : vector<8x4xf32> to vector<8x1xf32>
    %15 = vector.extract_strided_slice %1 {offsets = [2, 0], sizes = [1, 128], strides = [1, 1]} : vector<4x128xf32> to vector<1x128xf32>
    %16 = vector.broadcast %14 : vector<8x1xf32> to vector<8x128xf32>
    %17 = vector.broadcast %15 : vector<1x128xf32> to vector<8x128xf32>
    %18 = arith.mulf %16, %17 : vector<8x128xf32>
    %19 = arith.addf %13, %18 : vector<8x128xf32>
    %20 = vector.extract_strided_slice %2 {offsets = [0, 3], sizes = [8, 1], strides = [1, 1]} : vector<8x4xf32> to vector<8x1xf32>
    %21 = vector.extract_strided_slice %1 {offsets = [3, 0], sizes = [1, 128], strides = [1, 1]} : vector<4x128xf32> to vector<1x128xf32>
    %22 = vector.broadcast %20 : vector<8x1xf32> to vector<8x128xf32>
    %23 = vector.broadcast %21 : vector<1x128xf32> to vector<8x128xf32>
    %24 = arith.mulf %22, %23 : vector<8x128xf32>
    %25 = arith.addf %19, %24 : vector<8x128xf32>
    %c0_4 = arith.constant 0 : index
    %c0_5 = arith.constant 0 : index
    %26 = vector.load %arg4[%c0_4, %c0_5] : memref<8x1xf32, #tpu.memory_space<vmem>>, vector<8x1xf32>
    %27 = vector.broadcast %26 : vector<8x1xf32> to vector<8x128xf32>
    %28 = arith.addf %25, %27 : vector<8x128xf32>
    %c0_6 = arith.constant 0 : index
    %c0_7 = arith.constant 0 : index
    %c0_8 = arith.constant 0 : index
    %29 = vector.load %arg5[%c0_6, %c0_7, %c0_8] : memref<1x8x128xf32, #tpu.memory_space<vmem>>, vector<1x8x128xf32>
    %30 = vector.shape_cast %29 : vector<1x8x128xf32> to vector<8x128xf32>
    %31 = vector.shape_cast %28 : vector<8x128xf32> to vector<1x8x128xf32>
    tpu.vector_store %arg5[%c0_6, %c0_7, %c0_8], %31 {strides = array<i32>} : memref<1x8x128xf32, #tpu.memory_space<vmem>>, vector<1x8x128xf32>,
    return
  }
  func.func @transform_0(%arg0: i32, %arg1: i32) -> (i32, i32, i32) {
    %c0_i32 = arith.constant 0 : i32
    %c0_i32_0 = arith.constant 0 : i32
    return %arg0, %c0_i32, %arg1 : i32, i32, i32
  }
  func.func @transform_1(%arg0: i32, %arg1: i32) -> (i32, i32) {
    %c0_i32 = arith.constant 0 : i32
    %c0_i32_0 = arith.constant 0 : i32
    %c0_i32_1 = arith.constant 0 : i32
    return %c0_i32, %c0_i32_0 : i32, i32
  }
  func.func @transform_2(%arg0: i32, %arg1: i32) -> (i32, i32) {
    %c0_i32 = arith.constant 0 : i32
    %c0_i32_0 = arith.constant 0 : i32
    %c0_i32_1 = arith.constant 0 : i32
    return %c0_i32, %c0_i32_0 : i32, i32
  }
  func.func @transform_3(%arg0: i32, %arg1: i32) -> (i32, i32, i32) {
    %c0_i32 = arith.constant 0 : i32
    %c0_i32_0 = arith.constant 0 : i32
    return %arg0, %c0_i32, %arg1 : i32, i32, i32
  }
}

</mosaic_0001>

<bundles_post_ra>
// kernel: gdc_forward.1
= control target key start
LH: loop header
LB: loop body
LE: loop exit
PB: predicated region body
PF: predicated region fallthrough
CT: control target
= control target key end

     0   :  { %s451_s12 = smov 0   ;;  %s453_s13 = smov 0   ;;  %s516_s0 = inlined_call_operand.vmem [shape: f32[2,4,256], index: 0, kind: input, shape index: {}]   ;;  %s517_s1 = inlined_call_operand.vmem [shape: f32[8,4], index: 1, kind: input, shape index: {}]   ;;  %s518_s2 = inlined_call_operand.vmem [shape: f32[8,1], index: 2, kind: input, shape index: {}]   ;;  %s519_s3 = inlined_call_operand.vmem [shape: f32[2,8,256], index: 3, kind: output, shape index: {}]  }
   0x1   :  { %s455_s14 = smov 0   ;;  %s457_s15 = smov 0  }
   0x2   :  { %s459_s16 = smov 0  }
   0x3 LB: > { %s22_s17 = sadd.s32 1, %s417_s14  ;;  %s25_s18 = sadd.s32 1, %s421_s15  ;;  %s425_s16 = sphi %s459_s16, %s13_s16   ;;  %s421_s15 = sphi %s457_s15, %s523_s15   ;;  %s417_s14 = sphi %s455_s14, %s522_s14   ;;  %s413_s13 = sphi %s453_s13, %s521_s13   ;;  %s409_s12 = sphi %s451_s12, %s520_s12  }
   0x4   : > { %p23_p0 = scmp.ge.s32.totalorder %s22_s17, 2  ;;  %p330_p1 = scmp.ge.s32.totalorder %s425_s16, 1 }
   0x5   : > { %p156_p2 = scmp.lt.s32.totalorder %s425_s16, 5 }
   0x6   : > { %s525_s17 = smov (%p23_p0, %s22_s17), 0  ;;  %s527_s18 = smov (!%p23_p0, %s25_s18), %s421_s15 }
   0x7   : > { %p157_p3 = pnand %p330_p1, %p156_p2  ;;  %p27_p4 = scmp.ge.s32.totalorder %s527_s18, 2 }
   0x8   : > { %p186_p5 = scmp.lt.s32.totalorder (!%p157_p3), %s413_s13, 1  ;;  %p188_p6 = scmp.lt.s32.totalorder (!%p157_p3), %s409_s12, 1 }
   0x9   : > { %s529_s18 = smov (%p27_p4, %s527_s18), 0  ;;  %160 = sbr.rel (%p157_p3) target bundleno = 151 (0x97), region = 32 }
   0xe   : > { %v203_v0 = vld [vmem:[%s517_s1] sm:$0xff]  ;;  %v427_v1 = vmov 0   ;;  %v428_v2 = vmov 2   ;;  %v429_v4 = vmov 1   ;;  %v430_v5 = vmov 3   ;;  %s531_s13 = smov (!%p186_p5, %s413_s13), 1 }
   0xf   : > { %381 = vset.pattern.permute.xlu0 %v427_v1  ;;  %383 = vset.pattern.permute.xlu1 %v428_v2  ;;  %v232_v3 = vld [vmem:[%s518_s2] sm:$0xff]  ;;  %s533_s12 = smov (!%p188_p6, %s409_s12), 1  ;;  %s331_s23 = sshll.u32 %s531_s13, 1 }
  0x10   : > { %206 = vperm.xlu0 %381, %v203_v0   ;;  %219 = vperm.xlu1 %383, %v203_v0   ;;  %s191_s24 = sadd.s32 %s331_s23, %s533_s12 }
  0x11   : > { %385 = vset.pattern.permute.xlu2 %v427_v1  ;;  %s332_s25 = sshll.u32 %s191_s24, 2  ;;  %s334_s29 = sshll.u32 %s191_s24, 3 }
  0x12   : > { %235 = vperm.xlu2 %385, %v232_v3   ;;  %s193_s28 = scalar_lea.vmem %s516_s0, %s332_s25  ;;  %s201_s5 = scalar_lea.vmem %s519_s3, %s334_s29 }
  0x13   : > { %v202_v8 = vld [vmem:[%s193_s28] sm:$0xf] }
  0x14   : > { %v209_v9 = vperm.slane %v202_v8, 0  ;;  %v215_v10 = vperm.slane %v202_v8, 1  ;;  %v222_v11 = vperm.slane %v202_v8, 2  ;;  %v229_v12 = vperm.slane %v202_v8, 3 }
  0x18   : > { %382 = vset.pattern.permute.xlu0 %v429_v4  ;;  %384 = vset.pattern.permute.xlu1 %v430_v5 }
  0x19   : > { %212 = vperm.xlu0 %382, %v203_v0   ;;  %226 = vperm.xlu1 %384, %v203_v0  }
  0x21   : > { %386 = vset.pattern.permute.xlu0 %v427_v1 }
  0x6c   : > { %v236_v21 = vpop.permute.xlu2 %235 }
  0x82   : > { %v207_v6 = vpop.permute.xlu0 %206  ;;  %v220_v7 = vpop.permute.xlu1 %219 }
  0x83   : > { %v210_v15 = vmul.f32 %v209_v9, %v207_v6  ;;  %v223_v17 = vmul.f32 %v222_v11, %v220_v7 }
  0x8b   : > { %v213_v13 = vpop.permute.xlu0 %212  ;;  %v227_v14 = vpop.permute.xlu1 %226 }
  0x8c   : > { %v216_v16 = vmul.f32 %v215_v10, %v213_v13  ;;  %v230_v19 = vmul.f32 %v229_v12, %v227_v14 }
  0x8e   : > { %v217_v18 = vadd.f32 %v216_v16, %v210_v15 }
  0x90   : > { %v224_v20 = vadd.f32 %v223_v17, %v217_v18 }
  0x92   : > { %v231_v22 = vadd.f32 %v230_v19, %v224_v20 }
  0x94   : > { %v238_v23 = vadd.f32 %v236_v21, %v231_v22 }
  0x96   : > { %239 = vst [vmem:[%s201_s5] sm:$0xff] %v238_v23 }
  0x97 PF: > { %s13_s16 = sadd.s32 1, %s425_s16   ;;  %s520_s12 = smov %s417_s14 }
  0x98   : > { %p10_p7 = scmp.ge.s32.totalorder %s13_s16, 6   ;;  %s521_s13 = smov %s421_s15 }
  0x99   : > { %s522_s14 = smov %s525_s17  ;;  %s523_s15 = smov %s529_s18 }
  0x9a   :  { %12 = sbr.rel (!%p10_p7) target bundleno = 3 (0x3), region = 62 }

</bundles_post_ra>
